<compile_context>
chip_gen: v7x
topology: tpu7x:2x2x1
jax: 0.10.0
libtpu: 0.0.40
codegen_flags: <defaults>
</compile_context>

<pallas_src>
import jax
import jax.numpy as jnp
from jax.experimental import pallas as pl
from jax.experimental.pallas import tpu as pltpu


def _fake_t_kernel(st_ref, out_ref):
    # Pure passthrough of the trainable constant (one vreg copy; with the
    # in/out alias this is effectively a no-op identity).
    out_ref[...] = st_ref[...]


def fake_t_forward(x, st):
    """Equivalent of FakeT.forward(x): returns the (2,) parameter `st`.

    x  : any array (ignored, matching the reference module)
    st : (2,) float32 parameter
    """
    del x  # forward() ignores its input in the reference module; never DMA it.

    st = st.astype(jnp.float32)

    # Lane-dense staging tile: (8, 128) f32 == one vreg / 4 KiB.  Keep it this
    # small so it never competes for VMEM with real coupling-cell tiles
    # (especially on v7x's 64 MiB VMEM).
    st_tile = jnp.zeros((8, 128), jnp.float32).at[0, :2].set(st)

    out = pl.pallas_call(
        _fake_t_kernel,
        out_shape=jax.ShapeDtypeStruct((8, 128), jnp.float32),
        in_specs=[pl.BlockSpec(memory_space=pltpu.VMEM)],
        out_specs=pl.BlockSpec(memory_space=pltpu.VMEM),
        input_output_aliases={0: 0},
        cost_estimate=pl.CostEstimate(
            flops=0, transcendentals=0, bytes_accessed=2 * 8 * 128 * 4
        ),
    )(st_tile)

    # TODO(synk): when FakeT feeds a real coupling-cell kernel, pass `st` via
    # scalar prefetch / SMEM into that kernel instead of this standalone call.
    return out[0, :2]


if __name__ == "__main__":
    key = jax.random.PRNGKey(0)

    # Deterministic, non-trivial parameter values so the passthrough is
    # observable (FakeT defaults are s=0.0, t=0.0).
    s, t = 0.5, -1.25
    st = jnp.array([s, t], dtype=jnp.float32)

    # Example input consistent with a coupling-cell use (NCHW); unused by
    # forward, exactly like the reference module.
    x = jax.random.normal(key, (2, 4, 16, 16), dtype=jnp.float32)

    out = fake_t_forward(x, st)
    out = jax.block_until_ready(out)

    assert out.shape == (2,), out.shape
    assert out.dtype == jnp.float32, out.dtype
    assert bool(jnp.allclose(out, st)), (out, st)
    print("KERNEL_OK")
</pallas_src>

<mosaic_0001>
module attributes {stable_mosaic.version = 11 : i64} {
  func.func @_fake_t_kernel(%arg0: memref<8x128xf32, #tpu.memory_space<vmem>>, %arg1: memref<8x128xf32, #tpu.memory_space<vmem>>) attributes {dimension_semantics = [], scalar_prefetch = 0 : i64, scratch_operands = 0 : i64, tpu.core_type = #tpu.core_type<tc>} {
    %c0 = arith.constant 0 : index
    %c0_0 = arith.constant 0 : index
    %0 = vector.load %arg0[%c0, %c0_0] : memref<8x128xf32, #tpu.memory_space<vmem>>, vector<8x128xf32>
    %c0_1 = arith.constant 0 : index
    %c0_2 = arith.constant 0 : index
    %1 = vector.load %arg1[%c0_1, %c0_2] : memref<8x128xf32, #tpu.memory_space<vmem>>, vector<8x128xf32>
    tpu.vector_store %arg1[%c0_1, %c0_2], %0 {strides = array<i32>} : memref<8x128xf32, #tpu.memory_space<vmem>>, vector<8x128xf32>,
    return
  }
}

</mosaic_0001>

<bundles_post_ra>
// kernel: tpu_custom_call.1
= control target key start
LH: loop header
LB: loop body
LE: loop exit
PB: predicated region body
PF: predicated region fallthrough
CT: control target
= control target key end

     0   :  { %6 = vsyncpa [#allocation3], 0  ;;  %s124_s0 = inlined_call_operand.hbm [shape: f32[8,128], index: 0, kind: input, shape index: {}, may-alias: {0,1}]   ;;  %s125_s1 = inlined_call_operand.hbm [shape: f32[8,128], index: 1, kind: output, shape index: {}, may-alias: {0,1}]  }
   0x1   :  { %7 = vsyncpa [#allocation4], 0  ;;  %s88_s6 = smov [#allocation2]   ;;  %s40_s10 = scalar_lea.hbm %s124_s0, 128 }
   0x2   :  { %s14_s7 = sshll.u32 %s88_s6, 4  ;;  %p41_p0 = scmp.ne.s32.totalorder %s124_s0, %s40_s10  ;;  %s15_s7 = int_to_ptr.vmem [resolvable:$true] %s14_s7 }
   0x3   :  { %p44_p1 = scmp.lt.u32.totalorder %s40_s10, %s124_s0 }
   0x5   :  { %p46_p2 = pnand %p44_p1, %p41_p0 }
   0x7   :  { %49 = shalt.err (!%p46_p2)
}
   0x8   :  { %s50_s15 = scalar_lea.vmem %s15_s7, 128  ;;  %p55_p4 = scmp.lt.s32.totalorder %s15_s7, %s15_s7 }
   0x9   :  { %p51_p3 = scmp.ne.s32.totalorder %s15_s7, %s50_s15  ;;  %p56_p5 = scmp.lt.s32.totalorder %s50_s15, %s50_s15 }
   0xb   :  { %p57_p6 = por %p56_p5, %p55_p4 }
   0xd   :  { %p58_p7 = pnand %p57_p6, %p51_p3 }
   0xf   :  { %61 = shalt.err (!%p58_p7)
}
  0x10   :  { %17 = dma.hbm_to_vmem [thread:$0]  %s124_s0, 128, %s15_s7, [#allocation3]  }
  0x11   :  { %84 = dma.done.wait [#allocation3], 128  }
  0x12   :  { %85 = vsyncadd [#allocation3], 4294967168  ;;  %s89_s18 = smov [#allocation5]   ;;  %v21_v0 = vld [vmem:[#allocation2] sm:$0xff] }
  0x13   :  { %s29_s19 = sshll.u32 %s89_s18, 4  ;;  %22 = vst [vmem:[#allocation5] sm:$0xff] %v21_v0  ;;  %s30_s19 = int_to_ptr.vmem [resolvable:$true] %s29_s19 }
  0x14   :  { %s62_s20 = scalar_lea.vmem %s30_s19, 128  ;;  %p67_p9 = scmp.lt.s32.totalorder %s30_s19, %s30_s19 }
  0x15   :  { %p63_p8 = scmp.ne.s32.totalorder %s30_s19, %s62_s20  ;;  %p68_p10 = scmp.lt.s32.totalorder %s62_s20, %s62_s20 }
  0x17   :  { %p69_p11 = por %p68_p10, %p67_p9 }
  0x19   :  { %p70_p12 = pnand %p69_p11, %p63_p8 }
  0x1b   :  { %73 = shalt.err (!%p70_p12)
}
  0x1c   :  { %s74_s23 = scalar_lea.hbm %s125_s1, 128 }
  0x1d   :  { %p75_p13 = scmp.ne.s32.totalorder %s125_s1, %s74_s23  ;;  %p78_p0 = scmp.lt.u32.totalorder %s74_s23, %s125_s1 }
  0x1f   :  { %p80_p1 = pnand %p78_p0, %p75_p13 }
  0x21   :  { %83 = shalt.err (!%p80_p1)
}
  0x22   :  { %32 = dma.vmem_to_hbm [thread:$0]  %s30_s19, 128, %s125_s1, [#allocation4]  }
  0x23   :  { %86 = dma.done.wait [#allocation4], 128  }
  0x24   :  { %87 = vsyncadd [#allocation4], 4294967168 }
  0x25   :  { %36 = vsyncpa [#allocation3], 1 }
  0x26   :  { %37 = vsyncpa [#allocation4], 1 }

</bundles_post_ra>
